<compile_context>
chip_gen: v7x
topology: tpu7x:2x2x1
jax: 0.10.0
libtpu: 0.0.40
codegen_flags: <defaults>
</compile_context>

<pallas_src>
import functools

import jax
import jax.numpy as jnp
import numpy as np
from jax.experimental import pallas as pl
from jax.experimental.pallas import tpu as pltpu

_KH = 4  # largest branch kernel size; defines the shared padded halo (1 top/left, 2 bottom/right)


def _convblock_kernel(x_ref, t_ref, b_ref, o_ref, *, H):
    """Fused 4-branch 'same' conv, one batch element per grid step.

    x_ref: (1, H+3, (W+3)*Cin)    padded input, (W, Cin) flattened onto lanes
    t_ref: (4, (W+3)*Cin, W*Dtot) Toeplitz-folded weights (one slab per row tap ky)
    b_ref: (1, W*Dtot)            bias tiled across W
    o_ref: (1, H, W*Dtot)         lane-dense output slab
    """
    x = x_ref[0]                                        # (H+3, (W+3)*Cin)
    acc = jnp.zeros((H, o_ref.shape[-1]), jnp.float32)
    # Static unroll over the 4 row taps: each is one MXU matmul, contraction (W+3)*Cin.
    # NOTE(v6e): activations/weights could be cast to bf16 here (keep f32 accum)
    # to halve DMA bytes; kept f32 to match the f32 reference exactly.
    for ky in range(_KH):
        slab = x[ky:ky + H, :]                          # contiguous sublane slice, no relayout
        acc = acc + jnp.dot(slab, t_ref[ky],
                            preferred_element_type=jnp.float32)
    o_ref[0] = (acc + b_ref[...]).astype(o_ref.dtype)


def _build_folded_weights(params, W, Cin, Dtot):
    """Fold the 4 conv branches into 4 Toeplitz weight slabs + a tiled bias row.

    Returns T: (4, (W+3)*Cin, W*Dtot) and bias_row: (1, W*Dtot), built once
    host-side (numpy) so the kernel sees a single contiguous 2-D weight per tap.
    """
    # Combined per-tap weight in the shared padded frame: Wc[ky, kx, c, dcol].
    Wc = np.zeros((_KH, _KH, Cin, Dtot), np.float32)
    bias = np.zeros((Dtot,), np.float32)
    col = 0
    for (K, w, b) in params:                      # w: (K, K, Cin, d), b: (d,)
        d = w.shape[-1]
        pt = (K - 1) // 2                         # PyTorch 'same' asymmetric left/top pad
        off = 1 - pt                              # tap offset inside the shared (pad=1) halo
        Wc[off:off + K, off:off + K, :, col:col + d] = np.asarray(w)
        bias[col:col + d] = np.asarray(b)
        col += d

    Wp = W + _KH - 1
    T = np.zeros((_KH, Wp * Cin, W * Dtot), np.float32)
    for ky in range(_KH):
        for wo in range(W):
            for kx in range(_KH):
                wp = wo + kx
                T[ky, wp * Cin:(wp + 1) * Cin,
                  wo * Dtot:(wo + 1) * Dtot] = Wc[ky, kx]
    return jnp.asarray(T), jnp.asarray(np.tile(bias, W))[None, :]


def conv_block_fused(x_nchw, T, bias_row, Dtot):
    """Fused forward: NCHW in, NCHW out (concat of the 4 branches on channels)."""
    N, Cin, H, W = x_nchw.shape
    x_nhwc = jnp.transpose(x_nchw, (0, 2, 3, 1))
    # One shared pad covering every branch's asymmetric 'same' padding.
    xpad = jnp.pad(x_nhwc, ((0, 0), (1, 2), (1, 2), (0, 0)))
    xflat = xpad.reshape(N, H + _KH - 1, (W + _KH - 1) * Cin)
    Wd = W * Dtot

    # TODO(synk): for large spatial sizes, tile H (with a 3-row halo via manual
    # DMA) and/or W to bound the Toeplitz weight and per-block VMEM on v7x.
    kernel = functools.partial(_convblock_kernel, H=H)
    out = pl.pallas_call(
        kernel,
        out_shape=jax.ShapeDtypeStruct((N, H, Wd), x_nchw.dtype),
        grid=(N,),
        in_specs=[
            pl.BlockSpec((1, H + _KH - 1, (W + _KH - 1) * Cin),
                         lambda n: (n, 0, 0)),
            pl.BlockSpec(T.shape, lambda n: (0, 0, 0)),
            pl.BlockSpec(bias_row.shape, lambda n: (0, 0)),
        ],
        out_specs=pl.BlockSpec((1, H, Wd), lambda n: (n, 0, 0)),
        compiler_params=pltpu.CompilerParams(
            dimension_semantics=("parallel",),          # shards batch over v7x's 2 TCs
            vmem_limit_bytes=64 * 1024 * 1024),
    )(xflat, T, bias_row)

    # Lane-dense slab (N, H, W*Dtot) -> NCHW.
    return jnp.transpose(out.reshape(N, H, W, Dtot), (0, 3, 1, 2))


class ConvBlockPallas:
    """Mirror of the PyTorch ConvBlock: 4 parallel convs (k=1..4), channel concat."""

    def __init__(self, input_dim, output_dim, key):
        assert output_dim % 4 == 0
        self.input_dim = input_dim
        self.output_dim = output_dim
        d = output_dim // 4
        self.params = []
        for K in (1, 2, 3, 4):
            key, wk, bk = jax.random.split(key, 3)
            fan_in = input_dim * K * K
            bound = 1.0 / np.sqrt(fan_in)   # matches nn.Conv2d default init range
            w = jax.random.uniform(wk, (K, K, input_dim, d), jnp.float32,
                                   minval=-bound, maxval=bound)
            b = jax.random.uniform(bk, (d,), jnp.float32,
                                   minval=-bound, maxval=bound)
            self.params.append((K, w, b))
        self._folded = {}   # cached folded weights, keyed by spatial width W

    def __call__(self, x_nchw):
        # TODO(synk): `x.to(self.device)` has no in-kernel equivalent; device
        # placement is handled by the JAX TPU backend.
        W = x_nchw.shape[-1]
        if W not in self._folded:
            self._folded[W] = _build_folded_weights(
                self.params, W, self.input_dim, self.output_dim)
        T, bias_row = self._folded[W]
        return conv_block_fused(x_nchw, T, bias_row, self.output_dim)


def _reference(x_nchw, params):
    """Pure-JAX reference (XLA conv) reproducing PyTorch 'same' padding."""
    outs = []
    for K, w, b in params:
        D = w.shape[-1]
        w_oihw = jnp.transpose(w, (3, 2, 0, 1))           # (K,K,Cin,D) -> (D,Cin,K,K)
        pt = (K - 1) // 2
        pb = (K - 1) - pt
        y = jax.lax.conv_general_dilated(
            x_nchw, w_oihw, window_strides=(1, 1),
            padding=[(pt, pb), (pt, pb)],
            dimension_numbers=("NCHW", "OIHW", "NCHW"))
        outs.append(y + b.reshape(1, D, 1, 1))
    return jnp.concatenate(outs, axis=1)


if __name__ == "__main__":
    key = jax.random.PRNGKey(0)
    key, xk = jax.random.split(key)

    input_dim, output_dim = 4, 32
    x = jax.random.normal(xk, (2, input_dim, 16, 16), jnp.float32)  # NCHW

    block = ConvBlockPallas(input_dim, output_dim, key)
    y = jax.block_until_ready(block(x))

    assert y.shape == (2, output_dim, 16, 16), y.shape
    y_ref = jax.block_until_ready(_reference(x, block.params))
    np.testing.assert_allclose(np.asarray(y), np.asarray(y_ref),
                               atol=1e-2, rtol=1e-2)
    print("KERNEL_OK")
</pallas_src>

<mosaic_0001>
module attributes {stable_mosaic.version = 11 : i64} {
  func.func @_convblock_kernel(%arg0: i32, %arg1: memref<1x19x76xf32, #tpu.memory_space<vmem>>, %arg2: memref<4x76x512xf32, #tpu.memory_space<vmem>>, %arg3: memref<1x512xf32, #tpu.memory_space<vmem>>, %arg4: memref<1x16x512xf32, #tpu.memory_space<vmem>>) attributes {dimension_semantics = [#tpu.dimension_semantics<parallel>], iteration_bounds = array<i64: 2>, scalar_prefetch = 0 : i64, scratch_operands = 0 : i64, tpu.core_type = #tpu.core_type<tc>, window_params = [{transform_indices = @transform_0, window_bounds = array<i64: 1, 19, 76>}, {pipeline_mode = #tpu.pipeline_mode<synchronous>, transform_indices = @transform_1, window_bounds = array<i64: 4, 76, 512>}, {pipeline_mode = #tpu.pipeline_mode<synchronous>, transform_indices = @transform_2, window_bounds = array<i64: 1, 512>}, {transform_indices = @transform_3, window_bounds = array<i64: 1, 16, 512>}]} {
    %c0 = arith.constant 0 : index
    %c0_0 = arith.constant 0 : index
    %c0_1 = arith.constant 0 : index
    %0 = vector.load %arg1[%c0, %c0_0, %c0_1] : memref<1x19x76xf32, #tpu.memory_space<vmem>>, vector<1x19x76xf32>
    %1 = vector.shape_cast %0 : vector<1x19x76xf32> to vector<19x76xf32>
    %cst = arith.constant 0.000000e+00 : f32
    %2 = vector.broadcast %cst : f32 to vector<16x512xf32>
    %3 = vector.extract_strided_slice %1 {offsets = [0, 0], sizes = [16, 76], strides = [1, 1]} : vector<19x76xf32> to vector<16x76xf32>
    %c0_2 = arith.constant 0 : index
    %c0_3 = arith.constant 0 : index
    %c0_4 = arith.constant 0 : index
    %4 = vector.load %arg2[%c0_2, %c0_3, %c0_4] : memref<4x76x512xf32, #tpu.memory_space<vmem>>, vector<1x76x512xf32>
    %5 = vector.shape_cast %4 : vector<1x76x512xf32> to vector<76x512xf32>
    %cst_5 = arith.constant dense<0.000000e+00> : vector<16x512xf32>
    %6 = tpu.matmul %3, %5, %cst_5 {dimension_numbers = #tpu.dot_dimension_numbers<[1], [0], [0], [1], [0, 0, 1, 1], [], []>} : vector<16x76xf32>, vector<76x512xf32>, vector<16x512xf32> -> vector<16x512xf32>
    %7 = arith.addf %2, %6 : vector<16x512xf32>
    %8 = vector.extract_strided_slice %1 {offsets = [1, 0], sizes = [16, 76], strides = [1, 1]} : vector<19x76xf32> to vector<16x76xf32>
    %c1 = arith.constant 1 : index
    %c0_6 = arith.constant 0 : index
    %c0_7 = arith.constant 0 : index
    %9 = vector.load %arg2[%c1, %c0_6, %c0_7] : memref<4x76x512xf32, #tpu.memory_space<vmem>>, vector<1x76x512xf32>
    %10 = vector.shape_cast %9 : vector<1x76x512xf32> to vector<76x512xf32>
    %cst_8 = arith.constant dense<0.000000e+00> : vector<16x512xf32>
    %11 = tpu.matmul %8, %10, %cst_8 {dimension_numbers = #tpu.dot_dimension_numbers<[1], [0], [0], [1], [0, 0, 1, 1], [], []>} : vector<16x76xf32>, vector<76x512xf32>, vector<16x512xf32> -> vector<16x512xf32>
    %12 = arith.addf %7, %11 : vector<16x512xf32>
    %13 = vector.extract_strided_slice %1 {offsets = [2, 0], sizes = [16, 76], strides = [1, 1]} : vector<19x76xf32> to vector<16x76xf32>
    %c2 = arith.constant 2 : index
    %c0_9 = arith.constant 0 : index
    %c0_10 = arith.constant 0 : index
    %14 = vector.load %arg2[%c2, %c0_9, %c0_10] : memref<4x76x512xf32, #tpu.memory_space<vmem>>, vector<1x76x512xf32>
    %15 = vector.shape_cast %14 : vector<1x76x512xf32> to vector<76x512xf32>
    %cst_11 = arith.constant dense<0.000000e+00> : vector<16x512xf32>
    %16 = tpu.matmul %13, %15, %cst_11 {dimension_numbers = #tpu.dot_dimension_numbers<[1], [0], [0], [1], [0, 0, 1, 1], [], []>} : vector<16x76xf32>, vector<76x512xf32>, vector<16x512xf32> -> vector<16x512xf32>
    %17 = arith.addf %12, %16 : vector<16x512xf32>
    %18 = vector.extract_strided_slice %1 {offsets = [3, 0], sizes = [16, 76], strides = [1, 1]} : vector<19x76xf32> to vector<16x76xf32>
    %c3 = arith.constant 3 : index
    %c0_12 = arith.constant 0 : index
    %c0_13 = arith.constant 0 : index
    %19 = vector.load %arg2[%c3, %c0_12, %c0_13] : memref<4x76x512xf32, #tpu.memory_space<vmem>>, vector<1x76x512xf32>
    %20 = vector.shape_cast %19 : vector<1x76x512xf32> to vector<76x512xf32>
    %cst_14 = arith.constant dense<0.000000e+00> : vector<16x512xf32>
    %21 = tpu.matmul %18, %20, %cst_14 {dimension_numbers = #tpu.dot_dimension_numbers<[1], [0], [0], [1], [0, 0, 1, 1], [], []>} : vector<16x76xf32>, vector<76x512xf32>, vector<16x512xf32> -> vector<16x512xf32>
    %22 = arith.addf %17, %21 : vector<16x512xf32>
    %c0_15 = arith.constant 0 : index
    %c0_16 = arith.constant 0 : index
    %23 = vector.load %arg3[%c0_15, %c0_16] : memref<1x512xf32, #tpu.memory_space<vmem>>, vector<1x512xf32>
    %24 = vector.broadcast %23 : vector<1x512xf32> to vector<16x512xf32>
    %25 = arith.addf %22, %24 : vector<16x512xf32>
    %c0_17 = arith.constant 0 : index
    %c0_18 = arith.constant 0 : index
    %c0_19 = arith.constant 0 : index
    %26 = vector.load %arg4[%c0_17, %c0_18, %c0_19] : memref<1x16x512xf32, #tpu.memory_space<vmem>>, vector<1x16x512xf32>
    %27 = vector.shape_cast %26 : vector<1x16x512xf32> to vector<16x512xf32>
    %28 = vector.shape_cast %25 : vector<16x512xf32> to vector<1x16x512xf32>
    tpu.vector_store %arg4[%c0_17, %c0_18, %c0_19], %28 {strides = array<i32>} : memref<1x16x512xf32, #tpu.memory_space<vmem>>, vector<1x16x512xf32>,
    return
  }
  func.func @transform_0(%arg0: i32) -> (i32, i32, i32) {
    %c0_i32 = arith.constant 0 : i32
    %c0_i32_0 = arith.constant 0 : i32
    %c0_i32_1 = arith.constant 0 : i32
    return %arg0, %c0_i32, %c0_i32_0 : i32, i32, i32
  }
  func.func @transform_1(%arg0: i32) -> (i32, i32, i32) {
    %c0_i32 = arith.constant 0 : i32
    %c0_i32_0 = arith.constant 0 : i32
    %c0_i32_1 = arith.constant 0 : i32
    %c0_i32_2 = arith.constant 0 : i32
    return %c0_i32, %c0_i32_0, %c0_i32_1 : i32, i32, i32
  }
  func.func @transform_2(%arg0: i32) -> (i32, i32) {
    %c0_i32 = arith.constant 0 : i32
    %c0_i32_0 = arith.constant 0 : i32
    %c0_i32_1 = arith.constant 0 : i32
    return %c0_i32, %c0_i32_0 : i32, i32
  }
  func.func @transform_3(%arg0: i32) -> (i32, i32, i32) {
    %c0_i32 = arith.constant 0 : i32
    %c0_i32_0 = arith.constant 0 : i32
    %c0_i32_1 = arith.constant 0 : i32
    return %arg0, %c0_i32, %c0_i32_0 : i32, i32, i32
  }
}

</mosaic_0001>

<bundles_post_ra>
// kernel: tpu_custom_call.1
= control target key start
LH: loop header
LB: loop body
LE: loop exit
PB: predicated region body
PF: predicated region fallthrough
CT: control target
= control target key end

     0   :  { %8 = vsyncpa [#allocation3], 0  ;;  %s2096_s0 = inlined_call_operand.hbm [shape: f32[2,19,76], index: 0, kind: input, shape index: {}]   ;;  %s2097_s1 = inlined_call_operand.hbm [shape: f32[4,76,512], index: 1, kind: input, shape index: {}]   ;;  %s2098_s2 = inlined_call_operand.hbm [shape: f32[1,512], index: 2, kind: input, shape index: {}]   ;;  %s2099_s3 = inlined_call_operand.hbm [shape: f32[2,16,512], index: 3, kind: output, shape index: {}]  }
   0x1   :  { %10 = vsyncpa [#allocation3 + $0x1], 0 }
   0x2   :  { %11 = vsyncpa [#allocation6], 0 }
   0x3   :  { %12 = vsyncpa [#allocation4], 0 }
   0x4   :  { %14 = vsyncpa [#allocation4 + $0x1], 0  ;;  %s1761_s12 = smov 0   ;;  %s1763_s13 = smov 0  }
   0x5   :  { %s1765_s14 = smov 0   ;;  %s1767_s15 = smov 0  }
   0x6 LB: > { %s1782_s16 = sadd.s32 4294967295, %s1727_s15   ;;  %s1245_s17 = sadd.s32 4294967294, %s1727_s15   ;;  %s1727_s15 = sphi %s1767_s15, %s2121_s15   ;;  %s1723_s14 = sphi %s1765_s14, %s2120_s14   ;;  %s1719_s13 = sphi %s1763_s13, %s2119_s13   ;;  %s1715_s12 = sphi %s1761_s12, %s2118_s12  }
   0x7   : > { %p40_p0 = scmp.ne.s32.totalorder %s1719_s13, %s1715_s12  ;;  %p2100_p1 = scmp.eq.s32.totalorder %s1782_s16, 0 }
   0x8   : > { %p112_p3 = scmp.eq.s32.totalorder %s1245_s17, 1  ;;  %p1246_p5 = scmp.ge.s32.totalorder %s1727_s15, 1 }
   0x9   : > { %p1791_p4 = por %p2100_p1, %p40_p0  ;;  %p119_p7 = scmp.lt.s32.totalorder %s1727_s15, 3 }
   0xa   : > { %p1796_p6 = por %p112_p3, %p40_p0  ;;  %s1729_s21 = smov [#allocation5]  }
   0xb   : > { %s2103_s18 = scalar_select %p1791_p4, 1, 0 }
   0xc   : > { %s2104_s19 = scalar_select %p1796_p6, 1, 0 }
   0xd   : > { %p1801_p8 = pnand %p1246_p5, %p119_p7  ;;  %s131_s22 = sshll.u32 %s1729_s21, 4  ;;  %s1805_s22 = int_to_ptr.vmem [resolvable:$true] %s131_s22 }
   0xe   : > { %s1730_s24 = smov [#allocation7]   ;;  %s1571_s28 = scalar_lea.hbm %s2097_s1, 20480 }
   0xf   : > { %p1508_p9 = pneg %p1801_p8  ;;  %s145_s25 = sshll.u32 %s1730_s24, 4  ;;  %s1816_s25 = int_to_ptr.vmem [resolvable:$true] %s145_s25 }
  0x10   : > { %p1572_p12 = scmp.ne.s32.totalorder %s2097_s1, %s1571_s28  ;;  %p1578_p5 = scmp.lt.u32.totalorder %s1571_s28, %s2097_s1 }
  0x11   : > { %p1812_p11 = pnand %p1508_p9, %p2100_p1 }
  0x13   : > { %p1573_p13 = pneg %p1812_p11 }
  0x15   : > { %p1574_p0 = pnand %p1573_p13, %p1572_p12 }
  0x17   : > { %p1575_p3 = pneg %p1574_p0 }
  0x19   : > { %p1580_p7 = pnand %p1578_p5, %p1575_p3 }
  0x1b   : > { %1583 = shalt.err (!%p1580_p7)
}
  0x1c   : > { %s1584_s6 = scalar_lea.vmem %s1805_s22, 20480  ;;  %p1592_p2 = scmp.lt.s32.totalorder %s1805_s22, %s1805_s22 }
  0x1d   : > { %p1585_p9 = scmp.ne.s32.totalorder %s1805_s22, %s1584_s6  ;;  %p1593_p12 = scmp.lt.s32.totalorder %s1584_s6, %s1584_s6 }
  0x1f   : > { %p1587_p10 = pnand %p1585_p9, %p1573_p13  ;;  %p1594_p0 = por %p1593_p12, %p1592_p2 }
  0x21   : > { %p1588_p1 = pneg %p1587_p10 }
  0x23   : > { %p1595_p6 = pnand %p1594_p0, %p1588_p1 }
  0x25   : > { %1598 = shalt.err (!%p1595_p6)
}
  0x26   : > { %s1731_s7 = smov 512   ;;  %s1732_s8 = smov 32  }
  0x27   : > { %1511 = dma.hbm_to_vmem [thread:$0]  (!%p1812_p11), %s2097_s1, 20480, %s1805_s22, [#allocation6], %s1731_s7, %s1731_s7, %s1732_s8  }
  0x28   : > { %s1599_s21 = scalar_lea.hbm %s2098_s2, 64 }
  0x29   : > { %p1600_p2 = scmp.ne.s32.totalorder %s2098_s2, %s1599_s21  ;;  %p1606_p10 = scmp.lt.u32.totalorder %s1599_s21, %s2098_s2 }
  0x2b   : > { %p1602_p1 = pnand %p1600_p2, %p1573_p13 }
  0x2d   : > { %p1603_p6 = pneg %p1602_p1 }
  0x2f   : > { %p1608_p3 = pnand %p1606_p10, %p1603_p6 }
  0x31   : > { %1611 = shalt.err (!%p1608_p3)
}
  0x32   : > { %s1612_s22 = scalar_lea.vmem %s1816_s25, 64  ;;  %p1620_p12 = scmp.lt.s32.totalorder %s1816_s25, %s1816_s25 }
  0x33   : > { %p1613_p5 = scmp.ne.s32.totalorder %s1816_s25, %s1612_s22  ;;  %p1621_p0 = scmp.lt.s32.totalorder %s1612_s22, %s1612_s22 }
  0x35   : > { %p1615_p7 = pnand %p1613_p5, %p1573_p13  ;;  %p1622_p2 = por %p1621_p0, %p1620_p12 }
  0x37   : > { %p1616_p9 = pneg %p1615_p7 }
  0x39   : > { %p1623_p1 = pnand %p1622_p2, %p1616_p9 }
  0x3b   : > { %1626 = shalt.err (!%p1623_p1)
}
  0x3c   : > { %1514 = dma.hbm_to_vmem [thread:$0]  (!%p1812_p11), %s2098_s2, 64, %s1816_s25, [#allocation6]  }
  0x3d   : > { %s1871_s4 = sadd.s32 1, %s1727_s15   ;;  %s27_s23 = sadd.s32 1, %s1723_s14 }
  0x3e   : > { %s24_s5 = ssub.s32 %s1727_s15, %s1871_s4  ;;  %p34_p13 = scmp.ne.s32.totalorder %s1723_s14, %s1719_s13 }
  0x3f   : > { %p25_p6 = scmp.eq.s32.totalorder %s24_s5, 0  ;;  %p35_p10 = scmp.eq.s32.totalorder %s1727_s15, 0 }
  0x40   : > { %p2107_p3 = scmp.eq.s32.totalorder %s1782_s16, 1  ;;  %p1525_p7 = scmp.lt.s32.totalorder %s1727_s15, 2 }
  0x41   : > { %s1887_s7 = scalar_select %p25_p6, %s1723_s14, %s27_s23  }
  0x42   : > { %p1881_p5 = por %p2107_p3, %p34_p13  ;;  %p36_p9 = por %p35_p10, %p34_p13 }
  0x43   : > { %s156_s8 = sand.u32 1, %s1723_s14   ;;  %s1494_s25 = smul.u32 384, %s1727_s15 }
  0x44   : > { %s2108_s6 = scalar_select %p1881_p5, 1, 0 }
  0x45   : > { %s1493_s9 = smul.u32 24, %s156_s8  ;;  %p1891_p11 = pnand %p1525_p7, %p36_p9 }
  0x46   : > { %s1898_s21 = scalar_lea.hbm %s2096_s0, %s1494_s25  ;;  %s1902_s27 = scalar_lea.sflag [#allocation3], %s156_s8 }
  0x47   : > { %s160_s24 = scalar_lea.vmem [#allocation2], %s1493_s9  ;;  %s1627_s28 = scalar_lea.hbm %s1898_s21, 384 }
  0x48   : > { %s167_s26 = sshll.u32 %s160_s24, 4  ;;  %p1628_p12 = scmp.ne.s32.totalorder %s1898_s21, %s1627_s28  ;;  %s1900_s26 = int_to_ptr.vmem [resolvable:$true] %s167_s26 }
  0x49   : > { %p1629_p0 = pneg %p1891_p11  ;;  %s1632_s30 = scalar_lea.hbm %s2096_s0, 768 }
  0x4a   : > { %p1633_p13 = scmp.lt.u32.totalorder %s1898_s21, %s2096_s0  ;;  %p1634_p6 = scmp.lt.u32.totalorder %s1632_s30, %s1627_s28 }
  0x4b   : > { %p1630_p2 = pnand %p1629_p0, %p1628_p12  ;;  %p1636_p3 = scmp.lt.u32.totalorder %s1627_s28, %s1898_s21 }
  0x4c   : > { %p1635_p10 = por %p1634_p6, %p1633_p13 }
  0x4d   : > { %p1631_p1 = pneg %p1630_p2 }
  0x4e   : > { %p1637_p7 = por %p1636_p3, %p1635_p10 }
  0x50   : > { %p1638_p9 = pnand %p1637_p7, %p1631_p1 }
  0x52   : > { %1641 = shalt.err (!%p1638_p9)
}
  0x53   : > { %s1642_s8 = scalar_lea.vmem %s1900_s26, 384  ;;  %s1733_s9 = smov [#allocation2]  }
  0x54   : > { %p1643_p12 = scmp.ne.s32.totalorder %s1900_s26, %s1642_s8  ;;  %s1647_s25 = sshll.u32 %s1733_s9, 4  ;;  %s1648_s25 = int_to_ptr.vmem [resolvable:$false] %s1647_s25 }
  0x55   : > { %s1649_s11 = scalar_lea.vmem %s1648_s25, 768  ;;  %p1650_p4 = scmp.lt.s32.totalorder %s1900_s26, %s1648_s25 }
  0x56   : > { %p1645_p2 = pnand %p1643_p12, %p1629_p0  ;;  %p1651_p13 = scmp.lt.s32.totalorder %s1649_s11, %s1642_s8 }
  0x58   : > { %p1646_p5 = pneg %p1645_p2  ;;  %p1652_p6 = por %p1651_p13, %p1650_p4 }
  0x5a   : > { %p1653_p10 = pnand %p1652_p6, %p1646_p5 }
  0x5c   : > { %1656 = shalt.err (!%p1653_p10)
}
  0x5d   : > { %s1734_s17 = smov 128   ;;  %s1735_s24 = smov 8  }
  0x5e   : > { %1518 = dma.hbm_to_vmem [thread:$0]  (!%p1891_p11), %s1898_s21, 384, %s1900_s26, %s1902_s27, %s1734_s17, %s1734_s17, %s1735_s24  }
  0x5f   : > { %179 = sbr.rel (%p1801_p8) target bundleno = 425 (0x1a9), region = 32  ;;  %s1933_s28 = sand.u32 (!%p1801_p8), 1, %s1719_s13  }
  0x60   : > { %s1495_s22 = smul.u32 (!%p1801_p8), 24, %s1933_s28  ;;  %s182_s29 = scalar_lea.sflag (!%p1801_p8), [#allocation3], %s1933_s28 }
  0x61   : > { %p2110_p4 = scmp.ne.s32.totalorder (!%p1801_p8), %s2103_s18, 0 }
  0x62   : > { %s1937_s30 = scalar_lea.vmem (!%p1801_p8), [#allocation2], %s1495_s22 }
  0x66   : > { %1702 = dma.done.wait (%p2110_p4), %s182_s29, 384  }
  0x67   : > { %1704 = vsyncadd (%p2110_p4), %s182_s29, 4294966912  ;;  %p2111_p5 = scmp.eq.s32.totalorder %s1782_s16, 0 }
  0x69   : > { %1706 = dma.done.wait (%p2111_p5), [#allocation6], 20544   ;;  %p2112_p8 = pmov %p2111_p5 }
  0x6a   : > { %v1736_v0 = vmov 0.0   ;;  %v261_v1 = vld [vmem:[#allocation5 + $0x148] sm:$0xff]  ;;  %v263_v3 = vld [vmem:[#allocation5 + $0x158] sm:$0xff]  ;;  %v260_v6 = vld [vmem:[#allocation5 + $0x140] sm:$0xff]  ;;  %vm314_vm0 = vcmask 1043456   ;;  %vm1737_vm1 = vmmov 1  }
  0x6b   : > { %1708 = vsyncadd (%p2112_p8), [#allocation6], 4294946752  ;;  %391 = vmatprep.mubr.f32.mxu0 %v1736_v0  ;;  %468 = vmatprep.mubr.f32.mxu1 %v1736_v0  ;;  %v265_v2 = vld [vmem:[#allocation5 + $0x168] sm:$0xff]  ;;  %v267_v5 = vld [vmem:[#allocation5 + $0x178] sm:$0xff]  ;;  %vm303_vm3 = vcmask 1046528   ;;  %vm309_vm4 = vcmask 621568  }
  0x6c   : > { %v1293_v4 = vpack.c.bf16 %v265_v2, %v261_v1  ;;  %v264_v7 = vld [vmem:[#allocation5 + $0x160] sm:$0xff]  ;;  %v1315_v8 = vpack.c.bf16 %v267_v5, %v263_v3  ;;  %v262_v10 = vld [vmem:[#allocation5 + $0x150] sm:$0xff]  ;;  %v269_v12 = vld [vmem:[#allocation5 + $0x188] sm:$0xff]  ;;  %vm692_vm5 = vcmask 1045504   ;;  %vm917_vm6 = vcmask 1044480   ;;  %s1254_s18 = sshll.u32 %s1933_s28, 6 }
  0x6d   : > { %v1295_v9 = vpack.c.bf16 %v264_v7, %v260_v6  ;;  %v266_v11 = vld [vmem:[#allocation5 + $0x170] sm:$0xff]  ;;  %v273_v14 = vld [vmem:[#allocation5 + $0x1a8] sm:$0xff]  ;;  %v271_v15 = vld [vmem:[#allocation5 + $0x198] sm:$0xff]  ;;  %s215_s20 = scalar_lea.vmem [#allocation8], %s1254_s18  ;;  %s1292_s21 = sshll.u32 %s1782_s16, 10 }
  0x6e   : > { %1294 = vmatprep.subr.bf16.mxu0 %v1293_v4  ;;  %v1317_v13 = vpack.c.bf16 %v266_v11, %v262_v10  ;;  %v275_v16 = vld [vmem:[#allocation5 + $0x1b8] sm:$0xff]  ;;  %1316 = vmatprep.subr.bf16.mxu1 %v1315_v8  ;;  %v1297_v17 = vpack.c.bf16 %v273_v14, %v269_v12  ;;  %v268_v19 = vld [vmem:[#allocation5 + $0x180] sm:$0xff]  ;;  %v270_v21 = vld [vmem:[#allocation5 + $0x190] sm:$0xff]  ;;  %s1153_s10 = sshll.u32 %s215_s20, 4  ;;  %s2052_s16 = scalar_lea.hbm %s2099_s3, %s1292_s21  ;;  %s2047_s10 = int_to_ptr.vmem [resolvable:$true] %s1153_s10 }
  0x6f   : > { %1296 = vmatpush1.bf16.msra.mxu0 %v1295_v9  ;;  %v1319_v18 = vpack.c.bf16 %v275_v16, %v271_v15  ;;  %v272_v20 = vld [vmem:[#allocation5 + $0x1a0] sm:$0xff]  ;;  %v274_v23 = vld [vmem:[#allocation5 + $0x1b0] sm:$0xff]  ;;  %v277_v24 = vld [vmem:[#allocation5 + $0x1c8] sm:$0xff]  ;;  %s1140_s23 = scalar_lea.sflag [#allocation4], %s1933_s28  ;;  %s1657_s5 = scalar_lea.vmem %s2047_s10, 1024 }
  0x70   : > { %1318 = vmatpush1.bf16.msra.mxu1 %v1317_v13  ;;  %v1299_v22 = vpack.c.bf16 %v272_v20, %v268_v19  ;;  %v281_v25 = vld [vmem:[#allocation5 + $0x1e8] sm:$0xff]  ;;  %1298 = vmatprep.subr.bf16.mxu0 %v1297_v17  ;;  %v1321_v26 = vpack.c.bf16 %v274_v23, %v270_v21  ;;  %v279_v28 = vld [vmem:[#allocation5 + $0x1d8] sm:$0xff]  ;;  %v276_v30 = vld [vmem:[#allocation5 + $0x1c0] sm:$0xff]  ;;  %p1658_p11 = scmp.ne.s32.totalorder %s2047_s10, %s1657_s5  ;;  %p2115_p0 = scmp.ne.s32.totalorder %s2108_s6, 0 }
  0x71   : > { %1320 = vmatprep.subr.bf16.mxu1 %v1319_v18  ;;  %v1301_v27 = vpack.c.bf16 %v281_v25, %v277_v24  ;;  %v283_v29 = vld [vmem:[#allocation5 + $0x1f8] sm:$0xff]  ;;  %v280_v32 = vld [vmem:[#allocation5 + $0x1e0] sm:$0xff]  ;;  %v278_v33 = vld [vmem:[#allocation5 + $0x1d0] sm:$0xff]  ;;  %s1738_s8 = smov [#allocation8]  }
  0x72   : > { %v1323_v31 = vpack.c.bf16 %v283_v29, %v279_v28  ;;  %v282_v34 = vld [vmem:[#allocation5 + $0x1f0] sm:$0xff]  ;;  %v1303_v35 = vpack.c.bf16 %v280_v32, %v276_v30  ;;  %v285_v36 = vld [vmem:[#allocation5 + $0x208] sm:$0xff]  ;;  %v287_v38 = vld [vmem:[#allocation5 + $0x218] sm:$0xff]  ;;  %p1659_p1 = pnand %p1658_p11, %p2115_p0  ;;  %s1661_s9 = sshll.u32 %s1738_s8, 4  ;;  %s1662_s9 = int_to_ptr.vmem [resolvable:$false] %s1661_s9 }
  0x73   : > { %1300 = vmatpush1.bf16.msra.mxu0 %v1299_v22  ;;  %v289_v37 = vld [vmem:[#allocation5 + $0x228] sm:$0xff]  ;;  %v1325_v39 = vpack.c.bf16 %v282_v34, %v278_v33  ;;  %v291_v41 = vld [vmem:[#allocation5 + $0x238] sm:$0xff]  ;;  %v284_v42 = vld [vmem:[#allocation5 + $0x200] sm:$0xff]  ;;  %s1663_s25 = scalar_lea.vmem %s1662_s9, 2048  ;;  %p1664_p7 = scmp.lt.s32.totalorder %s2047_s10, %s1662_s9 }
  0x74   : > { %1322 = vmatpush1.bf16.msra.mxu1 %v1321_v26  ;;  %1302 = vmatprep.subr.bf16.mxu0 %v1301_v27  ;;  %v1305_v40 = vpack.c.bf16 %v289_v37, %v285_v36  ;;  %v288_v43 = vld [vmem:[#allocation5 + $0x220] sm:$0xff]  ;;  %v1327_v44 = vpack.c.bf16 %v291_v41, %v287_v38  ;;  %v286_v45 = vld [vmem:[#allocation5 + $0x210] sm:$0xff]  ;;  %v293_v47 = vld [vmem:[#allocation5 + $0x248] sm:$0xff]  ;;  %p1660_p3 = pneg %p1659_p1  ;;  %p1665_p9 = scmp.lt.s32.totalorder %s1663_s25, %s1657_s5 }
  0x75   : > { %1324 = vmatprep.subr.bf16.mxu1 %v1323_v31  ;;  %v290_v46 = vld [vmem:[#allocation5 + $0x230] sm:$0xff]  ;;  %v297_v48 = vld [vmem:[#allocation5 + $0x268] sm:$0xf]  ;;  %v295_v49 = vld [vmem:[#allocation5 + $0x258] sm:$0xff]  ;;  %v1307_v51 = vpack.c.bf16 %v288_v43, %v284_v42 }
  0x76   : > { %v299_v50 = vld [vmem:[#allocation5 + $0x278] sm:$0xf]  ;;  %vm1949_vm2 = vmpackc.low %vm314_vm0, %vm1737_vm1  ;;  %v292_v53 = vld [vmem:[#allocation5 + $0x240] sm:$0xff]  ;;  %v1329_v54 = vpack.c.bf16 %v290_v46, %v286_v45  ;;  %v1309_v55 = vpack.c.bf16 %v297_v48, %v293_v47  ;;  %p1666_p12 = por %p1665_p9, %p1664_p7 }
  0x77   : > { %1304 = vmatpush1.bf16.msra.mxu0 %v1303_v35  ;;  %v296_v56 = vld [vmem:[#allocation5 + $0x260] sm:$0xf]  ;;  %v294_v57 = vld [vmem:[#allocation5 + $0x250] sm:$0xff]  ;;  %v1331_v59 = vpack.c.bf16 %v299_v50, %v295_v49  ;;  %v220_v60 = vld [vmem:[#allocation5 + $0x8] sm:$0xff] }
  0x78   : > { %1326 = vmatpush1.bf16.msra.mxu1 %v1325_v39  ;;  %1306 = vmatprep.subr.bf16.mxu0 %v1305_v40  ;;  %v298_v58 = vld [vmem:[#allocation5 + $0x270] sm:$0xf]  ;;  %v224_v61 = vld [vmem:[#allocation5 + $0x28] sm:$0xff]  ;;  %v222_v63 = vld [vmem:[#allocation5 + $0x18] sm:$0xff]  ;;  %v1312_v3 = vpack.c.bf16 %v296_v56, %v292_v53  ;;  %p1667_p2 = pnand %p1666_p12, %p1660_p3 }
  0x79   : > { %1328 = vmatprep.subr.bf16.mxu1 %v1327_v44  ;;  %v1954_v62 = vld [vmem:[%s1937_s30] sm:$0xff]  ;;  %v226_v1 = vld [vmem:[#allocation5 + $0x38] sm:$0xff]  ;;  %v1334_v6 = vpack.c.bf16 %v298_v58, %v294_v57  ;;  %v1337_v7 = vpack.c.bf16 %v224_v61, %v220_v60  ;;  %v219_v8 = vld [vmem:[#allocation5] sm:$0xff] }
  0x7a   : > { %v1957_v2 = vld [vmem:[%s1937_s30 + $0x8] sm:$0xff]  ;;  %v304_v4 = vrot.slane %v1954_v62, 1  ;;  %v223_v9 = vld [vmem:[#allocation5 + $0x20] sm:$0xff]  ;;  %v1359_v11 = vpack.c.bf16 %v226_v1, %v222_v63  ;;  %v228_v13 = vld [vmem:[#allocation5 + $0x48] sm:$0xff] }
  0x7b   : > { %1308 = vmatpush1.bf16.msra.mxu0 %v1307_v51  ;;  %v305_v5 = vrot.slane %v1957_v2, 1  ;;  %v221_v10 = vld [vmem:[#allocation5 + $0x10] sm:$0xff]  ;;  %v232_v14 = vld [vmem:[#allocation5 + $0x68] sm:$0xff]  ;;  %v230_v15 = vld [vmem:[#allocation5 + $0x58] sm:$0xff]  ;;  %v1339_v18 = vpack.c.bf16 %v223_v9, %v219_v8 }
  0x7c   : > { %1330 = vmatpush1.bf16.msra.mxu1 %v1329_v54  ;;  %1311 = vmatprep.subr.msk.bf16.mxu0 %vm1949_vm2, %v1309_v55  ;;  %v225_v12 = vld [vmem:[#allocation5 + $0x30] sm:$0xff]  ;;  %v234_v16 = vld [vmem:[#allocation5 + $0x78] sm:$0xff]  ;;  %v1341_v20 = vpack.c.bf16 %v232_v14, %v228_v13  ;;  %v227_v21 = vld [vmem:[#allocation5 + $0x40] sm:$0xff] }
  0x7d   : > { %1333 = vmatprep.subr.msk.bf16.mxu1 %vm1949_vm2, %v1331_v59  ;;  %v306_v17 = vsel %vm303_vm3, %v304_v4, %v305_v5  ;;  %v1361_v19 = vpack.c.bf16 %v225_v12, %v221_v10  ;;  %v231_v22 = vld [vmem:[#allocation5 + $0x60] sm:$0xff]  ;;  %v229_v23 = vld [vmem:[#allocation5 + $0x50] sm:$0xff]  ;;  %v1363_v24 = vpack.c.bf16 %v234_v16, %v230_v15  ;;  %v236_v26 = vld [vmem:[#allocation5 + $0x88] sm:$0xff] }
  0x7e   : > { %v233_v25 = vld [vmem:[#allocation5 + $0x70] sm:$0xff]  ;;  %v240_v27 = vld [vmem:[#allocation5 + $0xa8] sm:$0xff]  ;;  %v238_v28 = vld [vmem:[#allocation5 + $0x98] sm:$0xff]  ;;  %v1343_v30 = vpack.c.bf16 %v231_v22, %v227_v21 }
  0x7f   : > { %1314 = vmatpush1.bf16.msk.msra.mxu0 %vm1949_vm2, %v1312_v3  ;;  %v242_v29 = vld [vmem:[#allocation5 + $0xb8] sm:$0xff]  ;;  %v235_v31 = vld [vmem:[#allocation5 + $0x80] sm:$0xff]  ;;  %v1365_v32 = vpack.c.bf16 %v233_v25, %v229_v23  ;;  %v1345_v33 = vpack.c.bf16 %v240_v27, %v236_v26  ;;  %v237_v35 = vld [vmem:[#allocation5 + $0x90] sm:$0xff] }
  0x80   : > { %1336 = vmatpush1.bf16.msk.msra.mxu1 %vm1949_vm2, %v1334_v6  ;;  %1338 = vmatprep.subr.bf16.mxu0 %v1337_v7  ;;  %v239_v34 = vld [vmem:[#allocation5 + $0xa0] sm:$0xff]  ;;  %v241_v36 = vld [vmem:[#allocation5 + $0xb0] sm:$0xff]  ;;  %v1367_v37 = vpack.c.bf16 %v242_v29, %v238_v28  ;;  %v244_v38 = vld [vmem:[#allocation5 + $0xc8] sm:$0xff] }
  0x81   : > { %1360 = vmatprep.subr.bf16.mxu1 %v1359_v11  ;;  %v248_v39 = vld [vmem:[#allocation5 + $0xe8] sm:$0xff]  ;;  %v1976_v40 = vld [vmem:[%s1937_s30 + $0x10] sm:$0x7]  ;;  %v1347_v44 = vpack.c.bf16 %v239_v34, %v235_v31  ;;  %v1369_v45 = vpack.c.bf16 %v241_v36, %v237_v35  ;;  %v245_v49 = vld [vmem:[#allocation5 + $0xd0] sm:$0xff] }
  0x82   : > { %1257 = vmatmul.mubr.msk.f32.vlgmr.msra.gmra.mrb[0].mxu0 %vm309_vm4, %v306_v17  ;;  %v246_v41 = vld [vmem:[#allocation5 + $0xd8] sm:$0xff]  ;;  %v307_v43 = vrot.slane %v1976_v40, 1  ;;  %v1349_v46 = vpack.c.bf16 %v248_v39, %v244_v38  ;;  %v243_v47 = vld [vmem:[#allocation5 + $0xc0] sm:$0xff]  ;;  %v249_v53 = vld [vmem:[#allocation5 + $0xf0] sm:$0xff] }
  0x83   : > { %1261 = vmatmul.mubr.msk.f32.vlgmr.msra.gmra.mrb[0].mxu1 %vm309_vm4, %v306_v17  ;;  %1340 = vmatpush1.bf16.msra.mxu0 %v1339_v18  ;;  %v250_v42 = vld [vmem:[#allocation5 + $0xf8] sm:$0xff]  ;;  %v247_v48 = vld [vmem:[#allocation5 + $0xe0] sm:$0xff]  ;;  %v252_v54 = vld [vmem:[#allocation5 + $0x108] sm:$0xff]  ;;  %v1373_v59 = vpack.c.bf16 %v249_v53, %v245_v49 }
  0x84   : > { %1362 = vmatpush1.bf16.msra.mxu1 %v1361_v19  ;;  %1342 = vmatprep.subr.bf16.mxu0 %v1341_v20  ;;  %v308_v50 = vsel %vm303_vm3, %v305_v5, %v307_v43  ;;  %v1371_v51 = vpack.c.bf16 %v250_v42, %v246_v41  ;;  %v256_v55 = vld [vmem:[#allocation5 + $0x128] sm:$0xf]  ;;  %v254_v56 = vld [vmem:[#allocation5 + $0x118] sm:$0xff]  ;;  %v1351_v58 = vpack.c.bf16 %v247_v48, %v243_v47  ;;  %v251_v61 = vld [vmem:[#allocation5 + $0x100] sm:$0xff] }
  0x85   : > { %1364 = vmatprep.subr.bf16.mxu1 %v1363_v24  ;;  %397 = vmatprep.mubr.f32.mxu0 %v1736_v0  ;;  %v258_v57 = vld [vmem:[#allocation5 + $0x138] sm:$0xf]  ;;  %v1353_v60 = vpack.c.bf16 %v256_v55, %v252_v54  ;;  %v255_v63 = vld [vmem:[#allocation5 + $0x120] sm:$0xf]  ;;  %v253_v1 = vld [vmem:[#allocation5 + $0x110] sm:$0xff] }
  0x86   : > { %474 = vmatprep.mubr.f32.mxu1 %v1736_v0  ;;  %1258 = vmatmul.mubr.msk.f32.gmra.mrb[2].mxu0 %vm309_vm4, %v308_v50  ;;  %v1375_v3 = vpack.c.bf16 %v258_v57, %v254_v56  ;;  %v257_v4 = vld [vmem:[#allocation5 + $0x130] sm:$0xf]  ;;  %v653_v5 = vld [vmem:[#allocation5 + $0x288] sm:$0xff]  ;;  %v655_v7 = vld [vmem:[#allocation5 + $0x298] sm:$0xff]  ;;  %v1356_v9 = vpack.c.bf16 %v255_v63, %v251_v61 }
  0x87   : > { %1344 = vmatpush1.bf16.msra.mxu0 %v1343_v30  ;;  %1262 = vmatmul.mubr.msk.f32.gmra.mrb[2].mxu1 %vm309_vm4, %v308_v50  ;;  %v657_v6 = vld [vmem:[#allocation5 + $0x2a8] sm:$0xff]  ;;  %v659_v8 = vld [vmem:[#allocation5 + $0x2b8] sm:$0xff]  ;;  %v1378_v10 = vpack.c.bf16 %v257_v4, %v253_v1  ;;  %v652_v12 = vld [vmem:[#allocation5 + $0x280] sm:$0xff] }
  0x88   : > { %1366 = vmatpush1.bf16.msra.mxu1 %v1365_v32  ;;  %1346 = vmatprep.subr.bf16.mxu0 %v1345_v33  ;;  %v1381_v11 = vpack.c.bf16 %v657_v6, %v653_v5  ;;  %v656_v13 = vld [vmem:[#allocation5 + $0x2a0] sm:$0xff]  ;;  %v654_v14 = vld [vmem:[#allocation5 + $0x290] sm:$0xff]  ;;  %v1403_v15 = vpack.c.bf16 %v659_v8, %v655_v7  ;;  %v661_v17 = vld [vmem:[#allocation5 + $0x2c8] sm:$0xff] }
  0x89   : > { %1368 = vmatprep.subr.bf16.mxu1 %v1367_v37  ;;  %561 = vmatprep.mubr.f32.mxu0 %v1736_v0  ;;  %v658_v16 = vld [vmem:[#allocation5 + $0x2b0] sm:$0xff]  ;;  %v665_v18 = vld [vmem:[#allocation5 + $0x2e8] sm:$0xff]  ;;  %v663_v19 = vld [vmem:[#allocation5 + $0x2d8] sm:$0xff]  ;;  %v1383_v21 = vpack.c.bf16 %v656_v13, %v652_v12  ;;  %v694_v12 = vrot.slane %v1957_v2, 2 }
  0x8a   : > { %638 = vmatprep.mubr.f32.mxu1 %v1736_v0  ;;  %v667_v20 = vld [vmem:[#allocation5 + $0x2f8] sm:$0xff]  ;;  %v1405_v22 = vpack.c.bf16 %v658_v16, %v654_v14  ;;  %v1385_v23 = vpack.c.bf16 %v665_v18, %v661_v17  ;;  %v660_v24 = vld [vmem:[#allocation5 + $0x2c0] sm:$0xff]  ;;  %v662_v26 = vld [vmem:[#allocation5 + $0x2d0] sm:$0xff] }
  0x8b   : > { %1348 = vmatpush1.bf16.msra.mxu0 %v1347_v44  ;;  %v664_v25 = vld [vmem:[#allocation5 + $0x2e0] sm:$0xff]  ;;  %v1407_v27 = vpack.c.bf16 %v667_v20, %v663_v19  ;;  %v666_v28 = vld [vmem:[#allocation5 + $0x2f0] sm:$0xff]  ;;  %v669_v29 = vld [vmem:[#allocation5 + $0x308] sm:$0xff] }
  0x8c   : > { %1370 = vmatpush1.bf16.msra.mxu1 %v1369_v45  ;;  %1350 = vmatprep.subr.bf16.mxu0 %v1349_v46  ;;  %v673_v30 = vld [vmem:[#allocation5 + $0x328] sm:$0xff]  ;;  %v671_v31 = vld [vmem:[#allocation5 + $0x318] sm:$0xff]  ;;  %v1387_v33 = vpack.c.bf16 %v664_v25, %v660_v24  ;;  %v1409_v34 = vpack.c.bf16 %v666_v28, %v662_v26  ;;  %v668_v36 = vld [vmem:[#allocation5 + $0x300] sm:$0xff]  ;;  %v696_v26 = vrot.slane %v1976_v40, 2 }
  0x8d   : > { %1372 = vmatprep.subr.bf16.mxu1 %v1371_v51  ;;  %v675_v32 = vld [vmem:[#allocation5 + $0x338] sm:$0xff]  ;;  %v1389_v35 = vpack.c.bf16 %v673_v30, %v669_v29  ;;  %v672_v37 = vld [vmem:[#allocation5 + $0x320] sm:$0xff]  ;;  %v670_v38 = vld [vmem:[#allocation5 + $0x310] sm:$0xff] }
  0x8e   : > { %v1411_v39 = vpack.c.bf16 %v675_v32, %v671_v31  ;;  %v674_v41 = vld [vmem:[#allocation5 + $0x330] sm:$0xff]  ;;  %v677_v42 = vld [vmem:[#allocation5 + $0x348] sm:$0xff]  ;;  %v679_v44 = vld [vmem:[#allocation5 + $0x358] sm:$0xff]  ;;  %v1391_v46 = vpack.c.bf16 %v672_v37, %v668_v36 }
  0x8f   : > { %1352 = vmatpush1.bf16.msra.mxu0 %v1351_v58  ;;  %v681_v43 = vld [vmem:[#allocation5 + $0x368] sm:$0xff]  ;;  %v683_v45 = vld [vmem:[#allocation5 + $0x378] sm:$0xff]  ;;  %v1413_v47 = vpack.c.bf16 %v674_v41, %v670_v38  ;;  %v676_v49 = vld [vmem:[#allocation5 + $0x340] sm:$0xff] }
  0x90   : > { %1374 = vmatpush1.bf16.msra.mxu1 %v1373_v59  ;;  %1355 = vmatprep.subr.msk.bf16.mxu0 %vm1949_vm2, %v1353_v60  ;;  %v1393_v48 = vpack.c.bf16 %v681_v43, %v677_v42  ;;  %v680_v50 = vld [vmem:[#allocation5 + $0x360] sm:$0xff]  ;;  %v678_v51 = vld [vmem:[#allocation5 + $0x350] sm:$0xff]  ;;  %v1415_v53 = vpack.c.bf16 %v683_v45, %v679_v44  ;;  %v685_v55 = vld [vmem:[#allocation5 + $0x388] sm:$0xff] }
  0x91   : > { %1377 = vmatprep.subr.msk.bf16.mxu1 %vm1949_vm2, %v1375_v3  ;;  %v682_v54 = vld [vmem:[#allocation5 + $0x370] sm:$0xff]  ;;  %v689_v56 = vld [vmem:[#allocation5 + $0x3a8] sm:$0xf]  ;;  %v687_v57 = vld [vmem:[#allocation5 + $0x398] sm:$0xff]  ;;  %v1395_v59 = vpack.c.bf16 %v680_v50, %v676_v49 }
  0x92   : > { %v691_v58 = vld [vmem:[#allocation5 + $0x3b8] sm:$0xf]  ;;  %v1417_v60 = vpack.c.bf16 %v682_v54, %v678_v51  ;;  %v1397_v61 = vpack.c.bf16 %v689_v56, %v685_v55  ;;  %v684_v63 = vld [vmem:[#allocation5 + $0x380] sm:$0xff]  ;;  %v686_v3 = vld [vmem:[#allocation5 + $0x390] sm:$0xff] }
  0x93   : > { %1358 = vmatpush1.bf16.msk.msra.mxu0 %vm1949_vm2, %v1356_v9  ;;  %v688_v1 = vld [vmem:[#allocation5 + $0x3a0] sm:$0xf]  ;;  %v1419_v4 = vpack.c.bf16 %v691_v58, %v687_v57  ;;  %v690_v5 = vld [vmem:[#allocation5 + $0x3b0] sm:$0xf]  ;;  %v878_v6 = vld [vmem:[#allocation5 + $0x3c8] sm:$0xff] }
  0x94   : > { %1380 = vmatpush1.bf16.msk.msra.mxu1 %vm1949_vm2, %v1378_v10  ;;  %1382 = vmatprep.subr.bf16.mxu0 %v1381_v11  ;;  %v882_v7 = vld [vmem:[#allocation5 + $0x3e8] sm:$0xff]  ;;  %v880_v8 = vld [vmem:[#allocation5 + $0x3d8] sm:$0xff]  ;;  %v1400_v10 = vpack.c.bf16 %v688_v1, %v684_v63  ;;  %v693_v11 = vrot.slane %v1954_v62, 2  ;;  %v1422_v13 = vpack.c.bf16 %v690_v5, %v686_v3  ;;  %v881_v16 = vld [vmem:[#allocation5 + $0x3e0] sm:$0xff] }
  0x95   : > { %1404 = vmatprep.subr.bf16.mxu1 %v1403_v15  ;;  %v884_v9 = vld [vmem:[#allocation5 + $0x3f8] sm:$0xff]  ;;  %v1425_v14 = vpack.c.bf16 %v882_v7, %v878_v6  ;;  %v877_v15 = vld [vmem:[#allocation5 + $0x3c0] sm:$0xff]  ;;  %v879_v17 = vld [vmem:[#allocation5 + $0x3d0] sm:$0xff] }
  0x96   : > { %1265 = vmatmul.mubr.msk.f32.vlgmr.msra.gmra.mrb[0].mxu0 %vm309_vm4, %v1954_v62  ;;  %v1447_v18 = vpack.c.bf16 %v884_v9, %v880_v8  ;;  %v883_v19 = vld [vmem:[#allocation5 + $0x3f0] sm:$0xff]  ;;  %v886_v20 = vld [vmem:[#allocation5 + $0x408] sm:$0xff]  ;;  %v695_v24 = vsel %vm692_vm5, %v693_v11, %v694_v12  ;;  %v1427_v25 = vpack.c.bf16 %v881_v16, %v877_v15  ;;  %v885_v29 = vld [vmem:[#allocation5 + $0x400] sm:$0xff] }
  0x97   : > { %1269 = vmatmul.mubr.msk.f32.vlgmr.msra.gmra.mrb[0].mxu1 %vm309_vm4, %v1954_v62  ;;  %1384 = vmatpush1.bf16.msra.mxu0 %v1383_v21  ;;  %v890_v21 = vld [vmem:[#allocation5 + $0x428] sm:$0xff]  ;;  %v889_v30 = vld [vmem:[#allocation5 + $0x420] sm:$0xff]  ;;  %v887_v31 = vld [vmem:[#allocation5 + $0x410] sm:$0xff] }
  0x98   : > { %1406 = vmatpush1.bf16.msra.mxu1 %v1405_v22  ;;  %1386 = vmatprep.subr.bf16.mxu0 %v1385_v23  ;;  %v888_v22 = vld [vmem:[#allocation5 + $0x418] sm:$0xff]  ;;  %v1429_v28 = vpack.c.bf16 %v890_v21, %v886_v20  ;;  %v1431_v38 = vpack.c.bf16 %v889_v30, %v885_v29  ;;  %v893_v43 = vld [vmem:[#allocation5 + $0x440] sm:$0xff]  ;;  %v895_v45 = vld [vmem:[#allocation5 + $0x450] sm:$0xff] }
  0x99   : > { %1408 = vmatprep.subr.bf16.mxu1 %v1407_v27  ;;  %567 = vmatprep.mubr.f32.mxu0 %v1736_v0  ;;  %v892_v23 = vld [vmem:[#allocation5 + $0x438] sm:$0xff]  ;;  %v1449_v27 = vpack.c.bf16 %v883_v19, %v879_v17  ;;  %v897_v44 = vld [vmem:[#allocation5 + $0x460] sm:$0xff]  ;;  %v906_v49 = vld [vmem:[#allocation5 + $0x4a8] sm:$0xff]  ;;  %v921_v17 = vrot.slane %v1976_v40, 3 }
  0x9a   : > { %644 = vmatprep.mubr.f32.mxu1 %v1736_v0  ;;  %1266 = vmatmul.mubr.msk.f32.gmra.mrb[2].mxu0 %vm309_vm4, %v1957_v2  ;;  %v1451_v32 = vpack.c.bf16 %v892_v23, %v888_v22  ;;  %v896_v36 = vld [vmem:[#allocation5 + $0x458] sm:$0xff]  ;;  %v901_v56 = vld [vmem:[#allocation5 + $0x480] sm:$0xff]  ;;  %v903_v58 = vld [vmem:[#allocation5 + $0x490] sm:$0xff] }
  0x9b   : > { %1388 = vmatpush1.bf16.msra.mxu0 %v1387_v33  ;;  %1270 = vmatmul.mubr.msk.f32.gmra.mrb[2].mxu1 %vm309_vm4, %v1957_v2  ;;  %v891_v33 = vld [vmem:[#allocation5 + $0x430] sm:$0xff]  ;;  %v900_v37 = vld [vmem:[#allocation5 + $0x478] sm:$0xff]  ;;  %v905_v57 = vld [vmem:[#allocation5 + $0x4a0] sm:$0xff] }
  0x9c   : > { %1410 = vmatpush1.bf16.msra.mxu1 %v1409_v34  ;;  %1390 = vmatprep.subr.bf16.mxu0 %v1389_v35  ;;  %v894_v34 = vld [vmem:[#allocation5 + $0x448] sm:$0xff]  ;;  %v1453_v41 = vpack.c.bf16 %v891_v33, %v887_v31  ;;  %v904_v50 = vld [vmem:[#allocation5 + $0x498] sm:$0xff]  ;;  %v909_v7 = vld [vmem:[#allocation5 + $0x4c0] sm:$0xff] }
  0x9d   : > { %1412 = vmatprep.subr.bf16.mxu1 %v1411_v39  ;;  %778 = vmatprep.mubr.f32.mxu0 %v1736_v0  ;;  %v898_v35 = vld [vmem:[#allocation5 + $0x468] sm:$0xff]  ;;  %v697_v39 = vsel %vm692_vm5, %v694_v12, %v696_v26  ;;  %v908_v51 = vld [vmem:[#allocation5 + $0x4b8] sm:$0xff]  ;;  %v913_v8 = vld [vmem:[#allocation5 + $0x4e0] sm:$0xf] }
  0x9e   : > { %855 = vmatprep.mubr.f32.mxu1 %v1736_v0  ;;  %v1433_v42 = vpack.c.bf16 %v898_v35, %v894_v34  ;;  %v914_v63 = vld [vmem:[#allocation5 + $0x4e8] sm:$0xf]  ;;  %v912_v1 = vld [vmem:[#allocation5 + $0x4d8] sm:$0xff]  ;;  %v915_v11 = vld [vmem:[#allocation5 + $0x4f0] sm:$0xf]  ;;  %v1444_v12 = vpack.c.bf16 %v913_v8, %v909_v7 }
  0x9f   : > { %1392 = vmatpush1.bf16.msra.mxu0 %v1391_v46  ;;  %v1455_v46 = vpack.c.bf16 %v900_v37, %v896_v36  ;;  %v916_v3 = vld [vmem:[#allocation5 + $0x4f8] sm:$0xf]  ;;  %v1101_v19 = vld [vmem:[#allocation7] sm:$0xf] }
  0xa0   : > { %1414 = vmatpush1.bf16.msra.mxu1 %v1413_v47  ;;  %1394 = vmatprep.subr.bf16.mxu0 %v1393_v48  ;;  %v899_v47 = vld [vmem:[#allocation5 + $0x470] sm:$0xff]  ;;  %v902_v48 = vld [vmem:[#allocation5 + $0x488] sm:$0xff]  ;;  %v1463_v9 = vpack.c.bf16 %v916_v3, %v912_v1 }
  0xa1   : > { %1416 = vmatprep.subr.bf16.mxu1 %v1415_v53  ;;  %v1435_v53 = vpack.c.bf16 %v897_v44, %v893_v43  ;;  %v1457_v54 = vpack.c.bf16 %v899_v47, %v895_v45  ;;  %v1437_v55 = vpack.c.bf16 %v906_v49, %v902_v48 }
  0xa3   : > { %1396 = vmatpush1.bf16.msra.mxu0 %v1395_v59  ;;  %v1459_v59 = vpack.c.bf16 %v908_v51, %v904_v50 }
  0xa4   : > { %1418 = vmatpush1.bf16.msra.mxu1 %v1417_v60  ;;  %1399 = vmatprep.subr.msk.bf16.mxu0 %vm1949_vm2, %v1397_v61  ;;  %v907_v60 = vld [vmem:[#allocation5 + $0x4b0] sm:$0xff]  ;;  %v910_v61 = vld [vmem:[#allocation5 + $0x4c8] sm:$0xff] }
  0xa5   : > { %1421 = vmatprep.subr.msk.bf16.mxu1 %vm1949_vm2, %v1419_v4  ;;  %v1439_v4 = vpack.c.bf16 %v905_v57, %v901_v56  ;;  %v1461_v5 = vpack.c.bf16 %v907_v60, %v903_v58  ;;  %v1441_v6 = vpack.c.bf16 %v914_v63, %v910_v61 }
  0xa7   : > { %1402 = vmatpush1.bf16.msk.msra.mxu0 %vm1949_vm2, %v1400_v10  ;;  %v911_v10 = vld [vmem:[#allocation5 + $0x4d0] sm:$0xff] }
  0xa8   : > { %1424 = vmatpush1.bf16.msk.msra.mxu1 %vm1949_vm2, %v1422_v13  ;;  %1426 = vmatprep.subr.bf16.mxu0 %v1425_v14  ;;  %v918_v13 = vrot.slane %v1954_v62, 3  ;;  %v919_v14 = vrot.slane %v1957_v2, 3  ;;  %v1466_v15 = vpack.c.bf16 %v915_v11, %v911_v10  ;;  %v1103_v2 = vlaneseq }
  0xa9   : > { %1448 = vmatprep.subr.bf16.mxu1 %v1447_v18 }
  0xaa   : > { %1273 = vmatmul.mubr.msk.f32.vlgmr.msra.gmra.mrb[0].mxu0 %vm309_vm4, %v695_v24  ;;  %v920_v16 = vsel %vm917_vm6, %v918_v13, %v919_v14  ;;  %v922_v62 = vsel %vm917_vm6, %v919_v14, %v921_v17  ;;  %v1104_v18 = vshrl.u32 %v1103_v2, 7 }
  0xab   : > { %1277 = vmatmul.mubr.msk.f32.vlgmr.msra.gmra.mrb[0].mxu1 %vm309_vm4, %v695_v24  ;;  %1428 = vmatpush1.bf16.msra.mxu0 %v1427_v25 }
  0xac   : > { %1450 = vmatpush1.bf16.msra.mxu1 %v1449_v27  ;;  %1430 = vmatprep.subr.bf16.mxu0 %v1429_v28  ;;  %v1105_v40 = vsub.s32 0, %v1104_v18  ;;  %v1113_v52 = vsub.s32 2, %v1104_v18  ;;  %v1109_v20 = vsub.s32 1, %v1104_v18  ;;  %v1117_v21 = vsub.s32 3, %v1104_v18 }
  0xad   : > { %1452 = vmatprep.subr.bf16.mxu1 %v1451_v32  ;;  %784 = vmatprep.mubr.f32.mxu0 %v1736_v0 }
  0xae   : > { %861 = vmatprep.mubr.f32.mxu1 %v1736_v0  ;;  %1274 = vmatmul.mubr.msk.f32.gmra.mrb[2].mxu0 %vm309_vm4, %v697_v39  ;;  %v1106_v22 = vrot.slane %v1101_v19, %v1105_v40  ;;  %v1114_v23 = vrot.slane %v1101_v19, %v1113_v52  ;;  %v1110_v24 = vrot.slane %v1101_v19, %v1109_v20 }
  0xaf   : > { %1432 = vmatpush1.bf16.msra.mxu0 %v1431_v38  ;;  %1278 = vmatmul.mubr.msk.f32.gmra.mrb[2].mxu1 %vm309_vm4, %v697_v39  ;;  %v1118_v25 = vrot.slane %v1101_v19, %v1117_v21 }
  0xb0   : > { %1454 = vmatpush1.bf16.msra.mxu1 %v1453_v41  ;;  %1434 = vmatprep.subr.bf16.mxu0 %v1433_v42 }
  0xb1   : > { %1456 = vmatprep.subr.bf16.mxu1 %v1455_v46  ;;  %1003 = vmatprep.mubr.f32.mxu0 %v1736_v0 }
  0xb2   : > { %1080 = vmatprep.mubr.f32.mxu1 %v1736_v0 }
  0xb3   : > { %1436 = vmatpush1.bf16.msra.mxu0 %v1435_v53 }
  0xb4   : > { %1458 = vmatpush1.bf16.msra.mxu1 %v1457_v54  ;;  %1438 = vmatprep.subr.bf16.mxu0 %v1437_v55 }
  0xb5   : > { %1460 = vmatprep.subr.bf16.mxu1 %v1459_v59 }
  0xb7   : > { %1440 = vmatpush1.bf16.msra.mxu0 %v1439_v4 }
  0xb8   : > { %1462 = vmatpush1.bf16.msra.mxu1 %v1461_v5  ;;  %1443 = vmatprep.subr.msk.bf16.mxu0 %vm1949_vm2, %v1441_v6 }
  0xb9   : > { %1465 = vmatprep.subr.msk.bf16.mxu1 %vm1949_vm2, %v1463_v9 }
  0xbb   : > { %1446 = vmatpush1.bf16.msk.msra.mxu0 %vm1949_vm2, %v1444_v12 }
  0xbc   : > { %1468 = vmatpush1.bf16.msk.msra.mxu1 %vm1949_vm2, %v1466_v15 }
  0xbe   : > { %1281 = vmatmul.mubr.msk.f32.vlgmr.msra.gmra.mrb[0].mxu0 %vm309_vm4, %v920_v16 }
  0xbf   : > { %1285 = vmatmul.mubr.msk.f32.vlgmr.msra.gmra.mrb[0].mxu1 %vm309_vm4, %v920_v16  ;;  %1009 = vmatprep.mubr.f32.mxu0 %v1736_v0 }
  0xc0   : > { %1086 = vmatprep.mubr.f32.mxu1 %v1736_v0 }
  0xc2   : > { %1282 = vmatmul.mubr.msk.f32.gmra.mrb[2].mxu0 %vm309_vm4, %v922_v62 }
  0xc3   : > { %1286 = vmatmul.mubr.msk.f32.gmra.mrb[2].mxu1 %vm309_vm4, %v922_v62 }
 0x191   : > { %v1005_v26 = vpop.f32.mrb[0].mxu0 }
 0x192   : > { %v1123_v27 = vadd.f32 %v1106_v22, %v1005_v26  ;;  %v1082_v0 = vpop.f32.mrb[0].mxu1  ;;  %v1007_v28 = vpop.f32.mrb[1].mxu0 }
 0x193   : > { %v1125_v29 = vadd.f32 %v1114_v23, %v1082_v0  ;;  %v1124_v30 = vadd.f32 %v1110_v24, %v1007_v28  ;;  %v1084_v31 = vpop.f32.mrb[1].mxu1 }
 0x194   : > { %1131 = vst [vmem:[%s215_s20] sm:$0xff] %v1123_v27  ;;  %v1126_v32 = vadd.f32 %v1118_v25, %v1084_v31 }
 0x195   : > { %1133 = vst [vmem:[%s215_s20 + $0x10] sm:$0xff] %v1125_v29  ;;  %1132 = vst [vmem:[%s215_s20 + $0x8] sm:$0xff] %v1124_v30  ;;  %v1011_v33 = vpop.f32.mrb[2].mxu0 }
 0x196   : > { %1134 = vst [vmem:[%s215_s20 + $0x18] sm:$0xff] %v1126_v32  ;;  %v1127_v34 = vadd.f32 %v1106_v22, %v1011_v33  ;;  %v1088_v35 = vpop.f32.mrb[2].mxu1  ;;  %v1013_v36 = vpop.f32.mrb[3].mxu0 }
 0x197   : > { %v1129_v37 = vadd.f32 %v1114_v23, %v1088_v35  ;;  %v1128_v38 = vadd.f32 %v1110_v24, %v1013_v36  ;;  %v1090_v39 = vpop.f32.mrb[3].mxu1 }
 0x198   : > { %1135 = vst [vmem:[%s215_s20 + $0x20] sm:$0xff] %v1127_v34  ;;  %v1130_v41 = vadd.f32 %v1118_v25, %v1090_v39 }
 0x199   : > { %1137 = vst [vmem:[%s215_s20 + $0x30] sm:$0xff] %v1129_v37  ;;  %1136 = vst [vmem:[%s215_s20 + $0x28] sm:$0xff] %v1128_v38 }
 0x19a   : > { %1138 = vst [vmem:[%s215_s20 + $0x38] sm:$0xff] %v1130_v41 }
 0x19b   : > { %1670 = shalt.err (!%p1667_p2)
}
 0x19c   : > { %s1671_s11 = scalar_lea.hbm %s2052_s16, 1024  ;;  %s1675_s22 = scalar_lea.hbm %s2099_s3, 2048 }
 0x19d   : > { %p1672_p13 = scmp.ne.s32.totalorder %s2052_s16, %s1671_s11  ;;  %p1676_p4 = scmp.lt.u32.totalorder %s2052_s16, %s2099_s3 }
 0x19e   : > { %p1677_p5 = scmp.lt.u32.totalorder %s1675_s22, %s1671_s11  ;;  %p1679_p11 = scmp.lt.u32.totalorder %s1671_s11, %s2052_s16 }
 0x19f   : > { %p1673_p6 = pnand %p1672_p13, %p2115_p0 }
 0x1a0   : > { %p1678_p8 = por %p1677_p5, %p1676_p4 }
 0x1a1   : > { %p1674_p10 = pneg %p1673_p6 }
 0x1a2   : > { %p1680_p1 = por %p1679_p11, %p1678_p8 }
 0x1a4   : > { %p1681_p3 = pnand %p1680_p1, %p1674_p10 }
 0x1a6   : > { %1684 = shalt.err (!%p1681_p3)
}
 0x1a7   : > { %s1739_s18 = smov 512   ;;  %s1740_s20 = smov 32  }
 0x1a8   : > { %1506 = dma.vmem_to_hbm [thread:$0]  (%p2115_p0), %s2047_s10, 1024, %s2052_s16, %s1140_s23, %s1739_s18, %s1739_s18, %s1740_s20  }
 0x1a9 PF: > { %s1168_s21 = sand.u32 1, %s1715_s12   ;;  %p2116_p7 = scmp.ne.s32.totalorder %s2104_s19, 0 }
 0x1aa   : > { %p2117_p9 = scmp.ge.s32.totalorder %s1727_s15, 2  ;;  %s1169_s26 = scalar_lea.sflag [#allocation4], %s1168_s21 }
 0x1ac   : > { %p1520_p12 = pnand %p2117_p9, %p2116_p7 }
 0x1ae   : > { %1710 = dma.done.wait (!%p1520_p12), %s1169_s26, 1024  }
 0x1af   : > { %1712 = vsyncadd (!%p1520_p12), %s1169_s26, 4294966272  ;;  %p17_p2 = scmp.ge.s32.totalorder %s1871_s4, 4   ;;  %s2118_s12 = smov %s1719_s13 }
 0x1b0   : > { %s2119_s13 = smov %s1723_s14  ;;  %s2120_s14 = smov %s1887_s7 }
 0x1b1   : > { %s2121_s15 = smov %s1871_s4  ;;  %19 = sbr.rel (!%p17_p2) target bundleno = 6 (0x6), region = 88 }
 0x1b8   :  { %1174 = vsyncpa [#allocation3], 1 }
 0x1b9   :  { %1176 = vsyncpa [#allocation3 + $0x1], 1 }
 0x1ba   :  { %1177 = vsyncpa [#allocation6], 1 }
 0x1bb   :  { %1178 = vsyncpa [#allocation4], 1 }
 0x1bc   :  { %1180 = vsyncpa [#allocation4 + $0x1], 1 }

</bundles_post_ra>
